<compile_context>
chip_gen: v7x
topology: tpu7x:2x2x1
jax: 0.10.0
libtpu: 0.0.40
codegen_flags: <defaults>
</compile_context>

<pallas_src>
import jax
import jax.numpy as jnp
from jax.experimental import pallas as pl
from jax.experimental.pallas import tpu as pltpu


def _round_up(x, m):
    return ((x + m - 1) // m) * m


def mlp_kernel(mix_ref, lang_ref, actnum_ref, act_ref, traj_ref,
               w1_ref, w1a_ref, w1b_ref, b1_ref, w2_ref, b2_ref, o_ref):
    """softmax-mixed input -> fc1 -> ReLU -> fc2 for one batch tile."""
    # 3 softmaxed mixing weights, read as scalars from SMEM.
    w_lang = mix_ref[0]
    w_acc = mix_ref[1]
    w_traj = mix_ref[2]

    # Elementwise mix in f32 (v5e VPU has no bf16).
    xm = w_lang * lang_ref[...] + w_traj * traj_ref[...]      # (TB, D)   f32
    an = w_acc * actnum_ref[...]                              # (TB, A)   f32
    af = w_acc * act_ref[...]                                 # (TB, D-A) f32

    # fc1: x @ W1 with the concat folded into three dots against W1 and its
    # two row-halves (bf16 operands, f32 accumulation on the MXU).
    h = jnp.dot(xm.astype(jnp.bfloat16), w1_ref[...],
                preferred_element_type=jnp.float32)
    h = h + jnp.dot(an.astype(jnp.bfloat16), w1a_ref[...],
                    preferred_element_type=jnp.float32)
    h = h + jnp.dot(af.astype(jnp.bfloat16), w1b_ref[...],
                    preferred_element_type=jnp.float32)
    h = jnp.maximum(h + b1_ref[...], 0.0)                     # (TB, Hp) f32

    # fc2 (lane-dense padded output columns are zero).
    y = jnp.dot(h.astype(jnp.bfloat16), w2_ref[...],
                preferred_element_type=jnp.float32) + b2_ref[...]
    o_ref[...] = y.astype(o_ref.dtype)                        # (TB, Op) unmasked store


def mlp_forward(language, act_num, act, traj, raw_w3, w1, b1, w2, b2,
                *, max_block_b=1024):
    B, D = language.shape
    A = act_num.shape[1]
    assert act.shape[1] + A == D, "act_num/act widths must sum to input_size"
    H = w1.shape[1]
    O = w2.shape[1]
    Hp = _round_up(H, 128)   # lane-dense hidden
    Op = _round_up(O, 128)   # lane-dense output stores

    # ---- one-time parameter prep (outside the per-row hot path) ------------
    mix = jax.nn.softmax(raw_w3.astype(jnp.float32))                     # (3,)
    w1p = jnp.pad(w1, ((0, 0), (0, Hp - H))).astype(jnp.bfloat16)        # (D, Hp)
    w1a = w1p[:A]                                                        # (A, Hp)
    w1b = w1p[A:]                                                        # (D-A, Hp)
    b1p = jnp.pad(jnp.reshape(b1, (1, H)),
                  ((0, 0), (0, Hp - H))).astype(jnp.float32)             # (1, Hp)
    w2p = jnp.pad(w2, ((0, Hp - H), (0, Op - O))).astype(jnp.bfloat16)   # (Hp, Op)
    b2p = jnp.pad(jnp.reshape(b2, (1, O)),
                  ((0, 0), (0, Op - O))).astype(jnp.float32)             # (1, Op)

    # ---- batch tile: multiple of 8, double-buffered blocks sized for v7x ---
    bytes_per_row = 4 * (3 * D + Op)            # f32 activation rows in + out
    budget = 8 * 1024 * 1024                    # well under v7x scoped VMEM
    tb_cap = max(8, (budget // (2 * bytes_per_row)) // 8 * 8)
    if B % 8 == 0:
        TB = min(B, max_block_b, tb_cap)
    else:
        TB = B      # tiny/ragged batch: single full-extent block (no pipeline)
    grid = (pl.cdiv(B, TB),)

    def act_spec(w):
        return pl.BlockSpec((TB, w), lambda i: (i, 0))

    def res_spec(r, c):                          # grid-resident (DMA'd once)
        return pl.BlockSpec((r, c), lambda i: (0, 0))

    weight_bytes = 2 * (2 * D * Hp + Hp * Op) + 4 * (Hp + Op)
    cost = pl.CostEstimate(
        flops=2 * B * (D * Hp + Hp * Op),
        transcendentals=0,
        bytes_accessed=4 * B * (3 * D + Op) + weight_bytes,
    )

    out_p = pl.pallas_call(
        mlp_kernel,
        out_shape=jax.ShapeDtypeStruct((B, Op), language.dtype),
        grid=grid,
        in_specs=[
            pl.BlockSpec(memory_space=pltpu.MemorySpace.SMEM),  # mix (3,) scalars
            act_spec(D),          # language
            act_spec(A),          # act_num
            act_spec(D - A),      # act
            act_spec(D),          # traj
            res_spec(D, Hp),      # W1 (full)
            res_spec(A, Hp),      # W1[:A]
            res_spec(D - A, Hp),  # W1[A:]
            res_spec(1, Hp),      # b1
            res_spec(Hp, Op),     # W2
            res_spec(1, Op),      # b2
        ],
        out_specs=pl.BlockSpec((TB, Op), lambda i: (i, 0)),
        compiler_params=pltpu.CompilerParams(
            dimension_semantics=("parallel",),    # shards batch across TCs (v7x)
            vmem_limit_bytes=32 * 1024 * 1024,    # safe under v7x's 64 MiB VMEM
        ),
        cost_estimate=cost,
    )(mix, language, act_num, act, traj, w1p, w1a, w1b, b1p, w2p, b2p)

    return out_p[:, :O]


def mlp_reference(language, act_num, act, traj, raw_w3, w1, b1, w2, b2):
    acc_all = jnp.concatenate([act_num, act], axis=1)
    w = jax.nn.softmax(raw_w3)
    x = w[0] * language + w[1] * acc_all + w[2] * traj
    h = jnp.maximum(x @ w1 + jnp.reshape(b1, (1, -1)), 0.0)
    return h @ w2 + jnp.reshape(b2, (1, -1))


if __name__ == "__main__":
    # small shapes consistent with the forward pass
    B = 8
    ACT_NUM_DIM, ACT_DIM = 12, 20
    INPUT_SIZE = ACT_NUM_DIM + ACT_DIM      # 32
    HIDDEN_SIZE = 64
    OUTPUT_SIZE = 16

    key = jax.random.PRNGKey(0)
    k = jax.random.split(key, 8)

    language = jax.random.normal(k[0], (B, INPUT_SIZE), dtype=jnp.float32)
    act_num  = jax.random.normal(k[1], (B, ACT_NUM_DIM), dtype=jnp.float32)
    act      = jax.random.normal(k[2], (B, ACT_DIM), dtype=jnp.float32)
    traj     = jax.random.normal(k[3], (B, INPUT_SIZE), dtype=jnp.float32)

    # deterministic synthetic parameters (shapes from MLP.__init__)
    raw_w3 = jax.random.normal(k[4], (3,), dtype=jnp.float32)          # self.weight
    w1 = jax.random.normal(k[5], (INPUT_SIZE, HIDDEN_SIZE), jnp.float32) * 0.1
    b1 = jnp.zeros((1, HIDDEN_SIZE), jnp.float32)
    w2 = jax.random.normal(k[6], (HIDDEN_SIZE, OUTPUT_SIZE), jnp.float32) * 0.1
    b2 = jnp.zeros((1, OUTPUT_SIZE), jnp.float32)

    out = mlp_forward(language, act_num, act, traj, raw_w3, w1, b1, w2, b2)
    out = jax.block_until_ready(out)

    ref = mlp_reference(language, act_num, act, traj, raw_w3, w1, b1, w2, b2)
    assert out.shape == (B, OUTPUT_SIZE)
    # bf16 MXU operands (f32 accumulation) -> compare at bf16-level tolerance
    assert jnp.allclose(out, ref, atol=2e-2, rtol=2e-2), "mismatch vs reference"

    print("KERNEL_OK")
</pallas_src>

<mosaic_0001>
module attributes {stable_mosaic.version = 11 : i64} {
  func.func @mlp_kernel(%arg0: i32, %arg1: memref<3xf32, #tpu.memory_space<smem>>, %arg2: memref<8x32xf32, #tpu.memory_space<vmem>>, %arg3: memref<8x12xf32, #tpu.memory_space<vmem>>, %arg4: memref<8x20xf32, #tpu.memory_space<vmem>>, %arg5: memref<8x32xf32, #tpu.memory_space<vmem>>, %arg6: memref<32x128xbf16, #tpu.memory_space<vmem>>, %arg7: memref<12x128xbf16, #tpu.memory_space<vmem>>, %arg8: memref<20x128xbf16, #tpu.memory_space<vmem>>, %arg9: memref<1x128xf32, #tpu.memory_space<vmem>>, %arg10: memref<128x128xbf16, #tpu.memory_space<vmem>>, %arg11: memref<1x128xf32, #tpu.memory_space<vmem>>, %arg12: memref<8x128xf32, #tpu.memory_space<vmem>>) attributes {dimension_semantics = [#tpu.dimension_semantics<parallel>], iteration_bounds = array<i64: 1>, scalar_prefetch = 0 : i64, scratch_operands = 0 : i64, tpu.core_type = #tpu.core_type<tc>, window_params = [{transform_indices = @transform_0, window_bounds = array<i64: 3>}, {transform_indices = @transform_1, window_bounds = array<i64: 8, 32>}, {transform_indices = @transform_2, window_bounds = array<i64: 8, 12>}, {transform_indices = @transform_3, window_bounds = array<i64: 8, 20>}, {transform_indices = @transform_4, window_bounds = array<i64: 8, 32>}, {pipeline_mode = #tpu.pipeline_mode<synchronous>, transform_indices = @transform_5, window_bounds = array<i64: 32, 128>}, {pipeline_mode = #tpu.pipeline_mode<synchronous>, transform_indices = @transform_6, window_bounds = array<i64: 12, 128>}, {pipeline_mode = #tpu.pipeline_mode<synchronous>, transform_indices = @transform_7, window_bounds = array<i64: 20, 128>}, {pipeline_mode = #tpu.pipeline_mode<synchronous>, transform_indices = @transform_8, window_bounds = array<i64: 1, 128>}, {pipeline_mode = #tpu.pipeline_mode<synchronous>, transform_indices = @transform_9, window_bounds = array<i64: 128, 128>}, {pipeline_mode = #tpu.pipeline_mode<synchronous>, transform_indices = @transform_10, window_bounds = array<i64: 1, 128>}, {transform_indices = @transform_11, window_bounds = array<i64: 8, 128>}]} {
    %c0 = arith.constant 0 : index
    %0 = memref.load %arg1[%c0] : memref<3xf32, #tpu.memory_space<smem>>
    %c1 = arith.constant 1 : index
    %1 = memref.load %arg1[%c1] : memref<3xf32, #tpu.memory_space<smem>>
    %c2 = arith.constant 2 : index
    %2 = memref.load %arg1[%c2] : memref<3xf32, #tpu.memory_space<smem>>
    %c0_0 = arith.constant 0 : index
    %c0_1 = arith.constant 0 : index
    %3 = vector.load %arg2[%c0_0, %c0_1] : memref<8x32xf32, #tpu.memory_space<vmem>>, vector<8x32xf32>
    %4 = vector.broadcast %0 : f32 to vector<8x32xf32>
    %5 = arith.mulf %4, %3 : vector<8x32xf32>
    %c0_2 = arith.constant 0 : index
    %c0_3 = arith.constant 0 : index
    %6 = vector.load %arg5[%c0_2, %c0_3] : memref<8x32xf32, #tpu.memory_space<vmem>>, vector<8x32xf32>
    %7 = vector.broadcast %2 : f32 to vector<8x32xf32>
    %8 = arith.mulf %7, %6 : vector<8x32xf32>
    %9 = arith.addf %5, %8 : vector<8x32xf32>
    %c0_4 = arith.constant 0 : index
    %c0_5 = arith.constant 0 : index
    %10 = vector.load %arg3[%c0_4, %c0_5] : memref<8x12xf32, #tpu.memory_space<vmem>>, vector<8x12xf32>
    %11 = vector.broadcast %1 : f32 to vector<8x12xf32>
    %12 = arith.mulf %11, %10 : vector<8x12xf32>
    %c0_6 = arith.constant 0 : index
    %c0_7 = arith.constant 0 : index
    %13 = vector.load %arg4[%c0_6, %c0_7] : memref<8x20xf32, #tpu.memory_space<vmem>>, vector<8x20xf32>
    %14 = vector.broadcast %1 : f32 to vector<8x20xf32>
    %15 = arith.mulf %14, %13 : vector<8x20xf32>
    %16 = arith.truncf %9 : vector<8x32xf32> to vector<8x32xbf16>
    %c0_8 = arith.constant 0 : index
    %c0_9 = arith.constant 0 : index
    %17 = vector.load %arg6[%c0_8, %c0_9] : memref<32x128xbf16, #tpu.memory_space<vmem>>, vector<32x128xbf16>
    %cst = arith.constant dense<0.000000e+00> : vector<8x128xf32>
    %18 = tpu.matmul %16, %17, %cst {dimension_numbers = #tpu.dot_dimension_numbers<[1], [0], [0], [1], [0, 0, 1, 1], [], []>} : vector<8x32xbf16>, vector<32x128xbf16>, vector<8x128xf32> -> vector<8x128xf32>
    %19 = arith.truncf %12 : vector<8x12xf32> to vector<8x12xbf16>
    %c0_10 = arith.constant 0 : index
    %c0_11 = arith.constant 0 : index
    %20 = vector.load %arg7[%c0_10, %c0_11] : memref<12x128xbf16, #tpu.memory_space<vmem>>, vector<12x128xbf16>
    %cst_12 = arith.constant dense<0.000000e+00> : vector<8x128xf32>
    %21 = tpu.matmul %19, %20, %cst_12 {dimension_numbers = #tpu.dot_dimension_numbers<[1], [0], [0], [1], [0, 0, 1, 1], [], []>} : vector<8x12xbf16>, vector<12x128xbf16>, vector<8x128xf32> -> vector<8x128xf32>
    %22 = arith.addf %18, %21 : vector<8x128xf32>
    %23 = arith.truncf %15 : vector<8x20xf32> to vector<8x20xbf16>
    %c0_13 = arith.constant 0 : index
    %c0_14 = arith.constant 0 : index
    %24 = vector.load %arg8[%c0_13, %c0_14] : memref<20x128xbf16, #tpu.memory_space<vmem>>, vector<20x128xbf16>
    %cst_15 = arith.constant dense<0.000000e+00> : vector<8x128xf32>
    %25 = tpu.matmul %23, %24, %cst_15 {dimension_numbers = #tpu.dot_dimension_numbers<[1], [0], [0], [1], [0, 0, 1, 1], [], []>} : vector<8x20xbf16>, vector<20x128xbf16>, vector<8x128xf32> -> vector<8x128xf32>
    %26 = arith.addf %22, %25 : vector<8x128xf32>
    %c0_16 = arith.constant 0 : index
    %c0_17 = arith.constant 0 : index
    %27 = vector.load %arg9[%c0_16, %c0_17] : memref<1x128xf32, #tpu.memory_space<vmem>>, vector<1x128xf32>
    %28 = vector.broadcast %27 : vector<1x128xf32> to vector<8x128xf32>
    %29 = arith.addf %26, %28 : vector<8x128xf32>
    %cst_18 = arith.constant 0.000000e+00 : f32
    %30 = vector.broadcast %cst_18 : f32 to vector<8x128xf32>
    %31 = arith.maximumf %29, %30 : vector<8x128xf32>
    %32 = arith.truncf %31 : vector<8x128xf32> to vector<8x128xbf16>
    %c0_19 = arith.constant 0 : index
    %c0_20 = arith.constant 0 : index
    %33 = vector.load %arg10[%c0_19, %c0_20] : memref<128x128xbf16, #tpu.memory_space<vmem>>, vector<128x128xbf16>
    %cst_21 = arith.constant dense<0.000000e+00> : vector<8x128xf32>
    %34 = tpu.matmul %32, %33, %cst_21 {dimension_numbers = #tpu.dot_dimension_numbers<[1], [0], [0], [1], [0, 0, 1, 1], [], []>} : vector<8x128xbf16>, vector<128x128xbf16>, vector<8x128xf32> -> vector<8x128xf32>
    %c0_22 = arith.constant 0 : index
    %c0_23 = arith.constant 0 : index
    %35 = vector.load %arg11[%c0_22, %c0_23] : memref<1x128xf32, #tpu.memory_space<vmem>>, vector<1x128xf32>
    %36 = vector.broadcast %35 : vector<1x128xf32> to vector<8x128xf32>
    %37 = arith.addf %34, %36 : vector<8x128xf32>
    %c0_24 = arith.constant 0 : index
    %c0_25 = arith.constant 0 : index
    %38 = vector.load %arg12[%c0_24, %c0_25] : memref<8x128xf32, #tpu.memory_space<vmem>>, vector<8x128xf32>
    tpu.vector_store %arg12[%c0_24, %c0_25], %37 {strides = array<i32>} : memref<8x128xf32, #tpu.memory_space<vmem>>, vector<8x128xf32>,
    return
  }
  func.func @transform_0(%arg0: i32) -> i32 {
    %c0_i32 = arith.constant 0 : i32
    %c0_i32_0 = arith.constant 0 : i32
    return %c0_i32 : i32
  }
  func.func @transform_1(%arg0: i32) -> (i32, i32) {
    %c0_i32 = arith.constant 0 : i32
    %c0_i32_0 = arith.constant 0 : i32
    return %arg0, %c0_i32 : i32, i32
  }
  func.func @transform_2(%arg0: i32) -> (i32, i32) {
    %c0_i32 = arith.constant 0 : i32
    %c0_i32_0 = arith.constant 0 : i32
    return %arg0, %c0_i32 : i32, i32
  }
  func.func @transform_3(%arg0: i32) -> (i32, i32) {
    %c0_i32 = arith.constant 0 : i32
    %c0_i32_0 = arith.constant 0 : i32
    return %arg0, %c0_i32 : i32, i32
  }
  func.func @transform_4(%arg0: i32) -> (i32, i32) {
    %c0_i32 = arith.constant 0 : i32
    %c0_i32_0 = arith.constant 0 : i32
    return %arg0, %c0_i32 : i32, i32
  }
  func.func @transform_5(%arg0: i32) -> (i32, i32) {
    %c0_i32 = arith.constant 0 : i32
    %c0_i32_0 = arith.constant 0 : i32
    %c0_i32_1 = arith.constant 0 : i32
    return %c0_i32, %c0_i32_0 : i32, i32
  }
  func.func @transform_6(%arg0: i32) -> (i32, i32) {
    %c0_i32 = arith.constant 0 : i32
    %c0_i32_0 = arith.constant 0 : i32
    %c0_i32_1 = arith.constant 0 : i32
    return %c0_i32, %c0_i32_0 : i32, i32
  }
  func.func @transform_7(%arg0: i32) -> (i32, i32) {
    %c0_i32 = arith.constant 0 : i32
    %c0_i32_0 = arith.constant 0 : i32
    %c0_i32_1 = arith.constant 0 : i32
    return %c0_i32, %c0_i32_0 : i32, i32
  }
  func.func @transform_8(%arg0: i32) -> (i32, i32) {
    %c0_i32 = arith.constant 0 : i32
    %c0_i32_0 = arith.constant 0 : i32
    %c0_i32_1 = arith.constant 0 : i32
    return %c0_i32, %c0_i32_0 : i32, i32
  }
  func.func @transform_9(%arg0: i32) -> (i32, i32) {
    %c0_i32 = arith.constant 0 : i32
    %c0_i32_0 = arith.constant 0 : i32
    %c0_i32_1 = arith.constant 0 : i32
    return %c0_i32, %c0_i32_0 : i32, i32
  }
  func.func @transform_10(%arg0: i32) -> (i32, i32) {
    %c0_i32 = arith.constant 0 : i32
    %c0_i32_0 = arith.constant 0 : i32
    %c0_i32_1 = arith.constant 0 : i32
    return %c0_i32, %c0_i32_0 : i32, i32
  }
  func.func @transform_11(%arg0: i32) -> (i32, i32) {
    %c0_i32 = arith.constant 0 : i32
    %c0_i32_0 = arith.constant 0 : i32
    return %arg0, %c0_i32 : i32, i32
  }
}

</mosaic_0001>

<bundles_post_ra>
// kernel: tpu_custom_call.1
= control target key start
LH: loop header
LB: loop body
LE: loop exit
PB: predicated region body
PF: predicated region fallthrough
CT: control target
= control target key end

     0   :  { %16 = vsyncpa [#allocation5], 0  ;;  %s1002_s0 = inlined_call_operand.hbm [shape: f32[3], index: 0, kind: input, shape index: {}]   ;;  %s1003_s1 = inlined_call_operand.hbm [shape: f32[8,32], index: 1, kind: input, shape index: {}]   ;;  %s1004_s2 = inlined_call_operand.hbm [shape: f32[8,12], index: 2, kind: input, shape index: {}]   ;;  %s1005_s3 = inlined_call_operand.hbm [shape: f32[8,20], index: 3, kind: input, shape index: {}]   ;;  %s1006_s4 = inlined_call_operand.hbm [shape: f32[8,32], index: 4, kind: input, shape index: {}]   ;;  %s1007_s5 = inlined_call_operand.vmem [shape: bf16[32,128], index: 5, kind: input, shape index: {}]   ;;  %s1008_s6 = inlined_call_operand.hbm [shape: bf16[12,128], index: 6, kind: input, shape index: {}]   ;;  %s1009_s7 = inlined_call_operand.hbm [shape: bf16[20,128], index: 7, kind: input, shape index: {}]   ;;  %s1010_s8 = inlined_call_operand.vmem [shape: f32[1,128], index: 8, kind: input, shape index: {}]   ;;  %s1011_s9 = inlined_call_operand.hbm [shape: bf16[128,128], index: 9, kind: input, shape index: {}]   ;;  %s1012_s10 = inlined_call_operand.vmem [shape: f32[1,128], index: 10, kind: input, shape index: {}]   ;;  %s1013_s11 = inlined_call_operand.hbm [shape: f32[8,128], index: 11, kind: output, shape index: {}]  }
   0x1   :  { %17 = vsyncpa [#allocation3], 0 }
   0x2   :  { %18 = vsyncpa [#allocation8], 0 }
   0x3   :  { %19 = vsyncpa [#allocation11], 0 }
   0x4   :  { %20 = vsyncpa [#allocation14], 0 }
   0x5   :  { %21 = vsyncpa [#allocation4], 0  ;;  %s776_s17 = smov [#allocation7]   ;;  %s777_s19 = smov [#allocation10]  }
   0x6   :  { %s46_s18 = sshll.u32 %s776_s17, 4  ;;  %s66_s20 = sshll.u32 %s777_s19, 4  ;;  %s47_s18 = int_to_ptr.vmem [resolvable:$true] %s46_s18  ;;  %s67_s20 = int_to_ptr.vmem [resolvable:$true] %s66_s20 }
   0x7   :  { %s578_s23 = scalar_lea.hbm %s1004_s2, 128 }
   0x8   :  { %p579_p0 = scmp.ne.s32.totalorder %s1004_s2, %s578_s23  ;;  %p582_p1 = scmp.lt.u32.totalorder %s578_s23, %s1004_s2 }
   0xa   :  { %p584_p2 = pnand %p582_p1, %p579_p0 }
   0xc   :  { %587 = shalt.err (!%p584_p2)
}
   0xd   :  { %s588_s28 = scalar_lea.vmem %s47_s18, 128  ;;  %p593_p4 = scmp.lt.s32.totalorder %s47_s18, %s47_s18 }
   0xe   :  { %p589_p3 = scmp.ne.s32.totalorder %s47_s18, %s588_s28  ;;  %p594_p5 = scmp.lt.s32.totalorder %s588_s28, %s588_s28 }
  0x10   :  { %p595_p6 = por %p594_p5, %p593_p4 }
  0x12   :  { %p596_p7 = pnand %p595_p6, %p589_p3 }
  0x14   :  { %599 = shalt.err (!%p596_p7)
}
  0x15   :  { %49 = dma.hbm_to_vmem [thread:$0]  %s1004_s2, 128, %s47_s18, [#allocation8]  }
  0x16   :  { %s600_s14 = scalar_lea.hbm %s1006_s4, 128 }
  0x17   :  { %p601_p8 = scmp.ne.s32.totalorder %s1006_s4, %s600_s14  ;;  %p604_p9 = scmp.lt.u32.totalorder %s600_s14, %s1006_s4 }
  0x19   :  { %p606_p10 = pnand %p604_p9, %p601_p8 }
  0x1b   :  { %609 = shalt.err (!%p606_p10)
}
  0x1c   :  { %s610_s21 = scalar_lea.vmem %s67_s20, 128  ;;  %p615_p12 = scmp.lt.s32.totalorder %s67_s20, %s67_s20 }
  0x1d   :  { %p611_p11 = scmp.ne.s32.totalorder %s67_s20, %s610_s21  ;;  %p616_p13 = scmp.lt.s32.totalorder %s610_s21, %s610_s21 }
  0x1f   :  { %p617_p0 = por %p616_p13, %p615_p12 }
  0x21   :  { %p618_p1 = pnand %p617_p0, %p611_p11 }
  0x23   :  { %621 = shalt.err (!%p618_p1)
}
  0x24   :  { %69 = dma.hbm_to_vmem [thread:$0]  %s1006_s4, 128, %s67_s20, [#allocation11]  }
  0x25   :  { %s778_s22 = smov [#allocation13]   ;;  %s779_s24 = smov [#allocation6]  }
  0x26   :  { %s89_s23 = sshll.u32 %s778_s22, 4  ;;  %s36_s25 = sshll.u32 %s779_s24, 4  ;;  %s90_s23 = int_to_ptr.vmem [resolvable:$true] %s89_s23  ;;  %s37_s25 = int_to_ptr.vmem [resolvable:$true] %s36_s25 }
  0x27   :  { %s622_s28 = scalar_lea.hbm %s1009_s7, 192 }
  0x28   :  { %p623_p2 = scmp.ne.s32.totalorder %s1009_s7, %s622_s28  ;;  %p626_p3 = scmp.lt.u32.totalorder %s622_s28, %s1009_s7 }
  0x2a   :  { %p628_p4 = pnand %p626_p3, %p623_p2 }
  0x2c   :  { %631 = shalt.err (!%p628_p4)
}
  0x2d   :  { %s632_s4 = scalar_lea.vmem %s90_s23, 192  ;;  %p637_p6 = scmp.lt.s32.totalorder %s90_s23, %s90_s23 }
  0x2e   :  { %p633_p5 = scmp.ne.s32.totalorder %s90_s23, %s632_s4  ;;  %p638_p7 = scmp.lt.s32.totalorder %s632_s4, %s632_s4 }
  0x30   :  { %p639_p8 = por %p638_p7, %p637_p6 }
  0x32   :  { %p640_p9 = pnand %p639_p8, %p633_p5 }
  0x34   :  { %643 = shalt.err (!%p640_p9)
}
  0x35   :  { %s780_s20 = smov 64   ;;  %s781_s14 = smov 4  }
  0x36   :  { %95 = dma.hbm_to_vmem [thread:$0]  %s1009_s7, 192, %s90_s23, [#allocation14], %s780_s20, %s780_s20, %s781_s14  }
  0x37   :  { %s644_s21 = scalar_lea.hbm %s1002_s0, 16 }
  0x38   :  { %p645_p10 = scmp.ne.s32.totalorder %s1002_s0, %s644_s21  ;;  %p648_p11 = scmp.lt.u32.totalorder %s644_s21, %s1002_s0 }
  0x3a   :  { %p650_p12 = pnand %p648_p11, %p645_p10 }
  0x3c   :  { %653 = shalt.err (!%p650_p12)
}
  0x3d   :  { %s782_s26 = smov [#allocation2]   ;;  %s654_s29 = scalar_lea.hbm %s1003_s1, 128 }
  0x3e   :  { %29 = dma.hbm_to_smem %s1002_s0, 16, %s782_s26, [#allocation5]  }
  0x3f   :  { %p655_p13 = scmp.ne.s32.totalorder %s1003_s1, %s654_s29  ;;  %p658_p0 = scmp.lt.u32.totalorder %s654_s29, %s1003_s1 }
  0x41   :  { %p660_p1 = pnand %p658_p0, %p655_p13 }
  0x43   :  { %663 = shalt.err (!%p660_p1)
}
  0x44   :  { %s664_s15 = scalar_lea.vmem %s37_s25, 128  ;;  %p669_p3 = scmp.lt.s32.totalorder %s37_s25, %s37_s25 }
  0x45   :  { %p665_p2 = scmp.ne.s32.totalorder %s37_s25, %s664_s15  ;;  %p670_p4 = scmp.lt.s32.totalorder %s664_s15, %s664_s15 }
  0x47   :  { %p671_p5 = por %p670_p4, %p669_p3 }
  0x49   :  { %p672_p6 = pnand %p671_p5, %p665_p2 }
  0x4b   :  { %675 = shalt.err (!%p672_p6)
}
  0x4c   :  { %39 = dma.hbm_to_vmem [thread:$0]  %s1003_s1, 128, %s37_s25, [#allocation3]  }
  0x4d   :  { %s783_s17 = smov [#allocation9]   ;;  %s784_s21 = smov [#allocation12]  }
  0x4e   :  { %s56_s19 = sshll.u32 %s783_s17, 4  ;;  %s77_s2 = sshll.u32 %s784_s21, 4  ;;  %s57_s19 = int_to_ptr.vmem [resolvable:$true] %s56_s19  ;;  %s78_s2 = int_to_ptr.vmem [resolvable:$true] %s77_s2 }
  0x4f   :  { %s676_s24 = scalar_lea.hbm %s1005_s3, 128 }
  0x50   :  { %p677_p7 = scmp.ne.s32.totalorder %s1005_s3, %s676_s24  ;;  %p680_p8 = scmp.lt.u32.totalorder %s676_s24, %s1005_s3 }
  0x52   :  { %p682_p9 = pnand %p680_p8, %p677_p7 }
  0x54   :  { %685 = shalt.err (!%p682_p9)
}
  0x55   :  { %s686_s1 = scalar_lea.vmem %s57_s19, 128  ;;  %p691_p11 = scmp.lt.s32.totalorder %s57_s19, %s57_s19 }
  0x56   :  { %p687_p10 = scmp.ne.s32.totalorder %s57_s19, %s686_s1  ;;  %p692_p12 = scmp.lt.s32.totalorder %s686_s1, %s686_s1 }
  0x58   :  { %p693_p13 = por %p692_p12, %p691_p11 }
  0x5a   :  { %p694_p0 = pnand %p693_p13, %p687_p10 }
  0x5c   :  { %697 = shalt.err (!%p694_p0)
}
  0x5d   :  { %59 = dma.hbm_to_vmem [thread:$0]  %s1005_s3, 128, %s57_s19, [#allocation8]  }
  0x5e   :  { %s698_s12 = scalar_lea.hbm %s1008_s6, 128 }
  0x5f   :  { %p699_p1 = scmp.ne.s32.totalorder %s1008_s6, %s698_s12  ;;  %p702_p2 = scmp.lt.u32.totalorder %s698_s12, %s1008_s6 }
  0x61   :  { %p704_p3 = pnand %p702_p2, %p699_p1 }
  0x63   :  { %707 = shalt.err (!%p704_p3)
}
  0x64   :  { %s708_s16 = scalar_lea.vmem %s78_s2, 128  ;;  %p713_p5 = scmp.lt.s32.totalorder %s78_s2, %s78_s2 }
  0x65   :  { %p709_p4 = scmp.ne.s32.totalorder %s78_s2, %s708_s16  ;;  %p714_p6 = scmp.lt.s32.totalorder %s708_s16, %s708_s16 }
  0x67   :  { %p715_p7 = por %p714_p6, %p713_p5 }
  0x69   :  { %p716_p8 = pnand %p715_p7, %p709_p4 }
  0x6b   :  { %719 = shalt.err (!%p716_p8)
}
  0x6c   :  { %83 = dma.hbm_to_vmem [thread:$0]  %s1008_s6, 128, %s78_s2, [#allocation11], %s780_s20, %s780_s20, %s781_s14  }
  0x6d   :  { %s785_s19 = smov [#allocation15]   ;;  %s720_s24 = scalar_lea.hbm %s1011_s9, 1024 }
  0x6e   :  { %s103_s21 = sshll.u32 %s785_s19, 4  ;;  %p721_p9 = scmp.ne.s32.totalorder %s1011_s9, %s720_s24  ;;  %s104_s21 = int_to_ptr.vmem [resolvable:$true] %s103_s21 }
  0x6f   :  { %p724_p10 = scmp.lt.u32.totalorder %s720_s24, %s1011_s9 }
  0x71   :  { %p726_p11 = pnand %p724_p10, %p721_p9 }
  0x73   :  { %729 = shalt.err (!%p726_p11)
}
  0x74   :  { %s730_s1 = scalar_lea.vmem %s104_s21, 1024  ;;  %p735_p13 = scmp.lt.s32.totalorder %s104_s21, %s104_s21 }
  0x75   :  { %p731_p12 = scmp.ne.s32.totalorder %s104_s21, %s730_s1  ;;  %p736_p0 = scmp.lt.s32.totalorder %s730_s1, %s730_s1 }
  0x77   :  { %p737_p1 = por %p736_p0, %p735_p13 }
  0x79   :  { %p738_p2 = pnand %p737_p1, %p731_p12 }
  0x7b   :  { %741 = shalt.err (!%p738_p2)
}
  0x7c   :  { %109 = dma.hbm_to_vmem [thread:$0]  %s1011_s9, 1024, %s104_s21, [#allocation14], %s780_s20, %s780_s20, %s781_s14  }
  0x7d   :  { %764 = dma.done.wait [#allocation5], 16  }
  0x7e   :  { %765 = vsyncadd [#allocation5], 4294967280 }
  0x7f   :  { %766 = dma.done.wait [#allocation3], 128  }
  0x80   :  { %767 = vsyncadd [#allocation3], 4294967168 }
  0x81   :  { %768 = dma.done.wait [#allocation8], 256  }
  0x82   :  { %769 = vsyncadd [#allocation8], 4294967040 }
  0x83   :  { %770 = dma.done.wait [#allocation11], 256  }
  0x84   :  { %771 = vsyncadd [#allocation11], 4294967040 }
  0x85   :  { %772 = dma.done.wait [#allocation14], 1216  }
  0x86   :  { %773 = vsyncadd [#allocation14], 4294966080 }
  0x87   :  { %136 = sfence }
  0x88   :  { %vm170_vm0 = vcmask 1045504   ;;  %v786_v0 = vmov 0.0   ;;  %v565_v1 = vld [vmem:[#allocation12] sm:$0x3f]   ;;  %s955_s25 = sld [smem:[#allocation2 + $0x1]]  ;;  %vm787_vm1 = vmmov 0  }
  0x89   :  { %510 = vmatprep.subr.bf16.mxu0 %v786_v0  ;;  %532 = vmatprep.subr.bf16.mxu1 %v786_v0  ;;  %v172_v2 = vsel %vm170_vm0, %v565_v1, 0  ;;  %s138_s9 = sld [smem:[#allocation2]]  ;;  %s474_s20 = sld [smem:[#allocation2 + $0x2]]  ;;  %v148_v3 = vld [vmem:[#allocation7] sm:$0xff]  ;;  %v141_v4 = vld [vmem:[#allocation6] sm:$0xff]  ;;  %v566_v6 = vld [vmem:[%s1007_s5] sm:$0xff]  }
  0x8a   :  { %512 = vmatprep.mubr.msk.bf16.mxu0 %vm787_vm1, %v786_v0  ;;  %548 = vmatprep.mubr.msk.bf16.mxu1 %vm787_vm1, %v786_v0  ;;  %v144_v7 = vld [vmem:[#allocation10] sm:$0xff]  ;;  %vm166_vm2 = vcmask 97280   ;;  %v151_v19 = vld [vmem:[#allocation9] sm:$0xff]  ;;  %vm226_vm3 = vcmask 261120   ;;  %v568_v20 = vld [vmem:[#allocation13] sm:$0xff]   ;;  %vm287_vm4 = vcmask 1041408  }
  0x8b   :  { %511 = vmatpush3.bf16.msra.mxu0 %v172_v2  ;;  %v570_v9 = vld [vmem:[#allocation15] sm:$0xff]   ;;  %v571_v10 = vld [vmem:[#allocation15 + $0x8] sm:$0xff]   ;;  %v569_v21 = vld [vmem:[#allocation13 + $0x8] ss:$0 sps:$4 sm:$0x33]   ;;  %vm283_vm5 = vcmask 162816  }
  0x8c   :  { %516 = vmatprep.subr.bf16.mxu0 %v786_v0  ;;  %533 = vmatpush3.bf16.msra.mxu1 %v570_v9  ;;  %v567_v16 = vld [vmem:[%s1007_s5 + $0x8] sm:$0xff]   ;;  %v289_v23 = vsel %vm287_vm4, %v569_v21, 0  ;;  %v572_v25 = vld [vmem:[#allocation15 + $0x10] sm:$0xff]   ;;  %v573_v26 = vld [vmem:[#allocation15 + $0x18] sm:$0xff]   ;;  %s788_s15 = smov [#allocation16]  }
  0x8d   :  { %534 = vmatprep.subr.bf16.mxu1 %v786_v0  ;;  %v574_v27 = vld [vmem:[#allocation15 + $0x20] sm:$0xff]   ;;  %v575_v28 = vld [vmem:[#allocation15 + $0x28] sm:$0xff]   ;;  %v576_v29 = vld [vmem:[#allocation15 + $0x30] sm:$0xff]   ;;  %s460_s0 = sshll.u32 %s788_s15, 4  ;;  %s461_s0 = int_to_ptr.vmem [resolvable:$true] %s460_s0 }
  0x8e   :  { %v149_v5 = vstv %s955_s25  ;;  %v577_v30 = vld [vmem:[#allocation15 + $0x38] sm:$0xff]   ;;  %p747_p4 = scmp.lt.s32.totalorder %s461_s0, %s461_s0 }
  0x8f   :  { %v150_v8 = vmul.f32 %v149_v5, %v148_v3  ;;  %v142_v12 = vstv %s138_s9  ;;  %v145_v13 = vstv %s474_s20  ;;  %v152_v22 = vmul.f32 %v151_v19, %v149_v5  ;;  %v483_v41 = vld [vmem:[%s1010_s8] ss:$0 sm:$0xff]  ;;  %s742_s8 = scalar_lea.vmem %s461_s0, 128 }
  0x90   :  { %v143_v14 = vmul.f32 %v142_v12, %v141_v4  ;;  %v146_v15 = vmul.f32 %v145_v13, %v144_v7  ;;  %535 = vmatpush3.bf16.msra.mxu1 %v571_v10  ;;  %v484_v49 = vld [vmem:[%s1012_s10] ss:$0 sm:$0xff]  ;;  %p743_p3 = scmp.ne.s32.totalorder %s461_s0, %s742_s8  ;;  %p748_p5 = scmp.lt.s32.totalorder %s742_s8, %s742_s8 }
  0x91   :  { %v158_v11 = vpack.c.bf16 %v150_v8, %v150_v8  ;;  %536 = vmatprep.subr.bf16.mxu1 %v786_v0  ;;  %v270_v24 = vpack.c.bf16 %v152_v22, %v152_v22 }
  0x92   :  { %v147_v17 = vadd.f32 %v146_v15, %v143_v14  ;;  %p749_p6 = por %p748_p5, %p747_p4 }
  0x93   :  { %513 = vmatmul.mubr.msk.bf16.vlgmr.msra.gmra.mrb[0].mxu0 %vm166_vm2, %v158_v11 }
  0x94   :  { %517 = vmatpush3.bf16.msra.mxu0 %v566_v6  ;;  %520 = vmatprep.mubr.msk.bf16.mxu0 %vm787_vm1, %v786_v0  ;;  %v153_v18 = vpack.c.bf16 %v147_v17, %v147_v17  ;;  %p750_p7 = pnand %p749_p6, %p743_p3 }
  0x95   :  { %518 = vmatprep.subr.bf16.mxu0 %v786_v0  ;;  %537 = vmatpush3.bf16.msra.mxu1 %v572_v25 }
  0x96   :  { %538 = vmatprep.subr.bf16.mxu1 %v786_v0 }
  0x98   :  { %519 = vmatpush3.bf16.msra.mxu0 %v567_v16 }
  0x99   :  { %524 = vmatprep.subr.bf16.mxu0 %v786_v0  ;;  %539 = vmatpush3.bf16.msra.mxu1 %v573_v26 }
  0x9a   :  { %540 = vmatprep.subr.bf16.mxu1 %v786_v0 }
  0x9b   :  { %521 = vmatmul.mubr.msk.bf16.vlgmr.msra.gmra.mrb[4].mxu0 %vm226_vm3, %v153_v18 }
  0x9c   :  { %525 = vmatpush3.bf16.msra.mxu0 %v568_v20  ;;  %528 = vmatprep.mubr.msk.bf16.mxu0 %vm787_vm1, %v786_v0 }
  0x9d   :  { %526 = vmatprep.subr.bf16.mxu0 %v786_v0  ;;  %541 = vmatpush3.bf16.msra.mxu1 %v574_v27 }
  0x9e   :  { %542 = vmatprep.subr.bf16.mxu1 %v786_v0 }
  0xa0   :  { %527 = vmatpush3.bf16.msra.mxu0 %v289_v23 }
  0xa1   :  { %543 = vmatpush3.bf16.msra.mxu1 %v575_v28 }
  0xa2   :  { %544 = vmatprep.subr.bf16.mxu1 %v786_v0 }
  0xa3   :  { %529 = vmatmul.mubr.msk.bf16.vlgmr.msra.gmra.mrb[8].mxu0 %vm283_vm5, %v270_v24 }
  0xa5   :  { %545 = vmatpush3.bf16.msra.mxu1 %v576_v29 }
  0xa6   :  { %546 = vmatprep.subr.bf16.mxu1 %v786_v0 }
  0xa9   :  { %547 = vmatpush3.bf16.msra.mxu1 %v577_v30 }
 0x166   :  { %v208_v31 = vpop.f32.mrb[0].mxu0 }
 0x167   :  { %v514_v32 = vpop.f32.mrb[1].mxu0 }
 0x168   :  { %v211_v33 = vpop.f32.mrb[2].mxu0 }
 0x169   :  { %v515_v34 = vpop.f32.mrb[3].mxu0 }
 0x16e   :  { %v264_v35 = vpop.f32.mrb[4].mxu0 }
 0x16f   :  { %v265_v36 = vadd.f32 %v264_v35, %v208_v31  ;;  %v522_v37 = vpop.f32.mrb[5].mxu0 }
 0x170   :  { %v267_v38 = vpop.f32.mrb[6].mxu0 }
 0x171   :  { %v523_v39 = vpop.f32.mrb[7].mxu0 }
 0x176   :  { %v325_v40 = vpop.f32.mrb[8].mxu0 }
 0x177   :  { %v331_v42 = vadd.f32 %v325_v40, %v265_v36  ;;  %v530_v43 = vpop.f32.mrb[9].mxu0 }
 0x178   :  { %v328_v44 = vpop.f32.mrb[10].mxu0 }
 0x179   :  { %v339_v45 = vadd.f32 %v483_v41, %v331_v42  ;;  %v531_v46 = vpop.f32.mrb[11].mxu0 }
 0x17b   :  { %v340_v47 = vmax.f32 %v339_v45, 0.0 }
 0x17d   :  { %v341_v48 = vpack.c.bf16 %v340_v47, %v340_v47 }
 0x17f   :  { %549 = vmatmul.mubr.bf16.vlgmr.msra.gmra.mrb[0].mxu1 %v341_v48 }
 0x252   :  { %v447_v50 = vpop.f32.mrb[0].mxu1 }
 0x253   :  { %v448_v51 = vadd.f32 %v484_v49, %v447_v50  ;;  %v550_v52 = vpop.f32.mrb[1].mxu1 }
 0x254   :  { %v450_v53 = vpop.f32.mrb[2].mxu1 }
 0x255   :  { %453 = vst [vmem:[#allocation16] sm:$0xff] %v448_v51  ;;  %v551_v54 = vpop.f32.mrb[3].mxu1 }
 0x256   :  { %753 = shalt.err (!%p750_p7)
}
 0x257   :  { %s754_s10 = scalar_lea.hbm %s1013_s11, 128 }
 0x258   :  { %p755_p8 = scmp.ne.s32.totalorder %s1013_s11, %s754_s10  ;;  %p758_p9 = scmp.lt.u32.totalorder %s754_s10, %s1013_s11 }
 0x25a   :  { %p760_p10 = pnand %p758_p9, %p755_p8 }
 0x25c   :  { %763 = shalt.err (!%p760_p10)
}
 0x25d   :  { %463 = dma.vmem_to_hbm [thread:$0]  %s461_s0, 128, %s1013_s11, [#allocation4]  }
 0x25e   :  { %774 = dma.done.wait [#allocation4], 128  }
 0x25f   :  { %775 = vsyncadd [#allocation4], 4294967168 }
 0x260   :  { %467 = vsyncpa [#allocation3], 1 }
 0x261   :  { %468 = vsyncpa [#allocation8], 1 }
 0x262   :  { %469 = vsyncpa [#allocation11], 1 }
 0x263   :  { %470 = vsyncpa [#allocation14], 1 }
 0x264   :  { %471 = vsyncpa [#allocation4], 1 }
 0x265   :  { %472 = vsyncpa [#allocation5], 1 }

</bundles_post_ra>
